<compile_context>
chip_gen: v5e
topology: v5e:2x2
jax: 0.10.0
libtpu: 0.0.40
codegen_flags: <defaults>
</compile_context>

<pallas_src>
import functools
import math

import jax
import jax.numpy as jnp
from jax.experimental import pallas as pl
from jax.experimental.pallas import tpu as pltpu

HIDDEN = 64  # fixed by the module definition


def _round_up(x, m):
    return (x + m - 1) // m * m


def _mlp_kernel(x_ref, w1_ref, b1_ref, w2_ref, b2_ref, o_ref):
    """Fused 2-layer MLP (pack-expanded): matmul + bias + ReLU, twice.

    x_ref : (tb/pack, pack*num_mtdt)    compute dtype (bf16 by default)
    w1_ref: (pack*num_mtdt, pack*64)    block-diagonal W1
    b1_ref: (1, pack*64)                f32
    w2_ref: (pack*64, pack*out_ch)      block-diagonal W2
    b2_ref: (1, pack*out_ch)            f32
    o_ref : (tb/pack, pack*out_ch)      lane-dense output slab
    """
    h = jnp.dot(x_ref[...], w1_ref[...], preferred_element_type=jnp.float32)
    h = jnp.maximum(h + b1_ref[...], 0.0)                 # bias + ReLU in f32
    y = jnp.dot(h.astype(w2_ref.dtype), w2_ref[...],
                preferred_element_type=jnp.float32)
    y = jnp.maximum(y + b2_ref[...], 0.0)
    o_ref[...] = y.astype(o_ref.dtype)


@functools.partial(jax.jit,
                   static_argnames=("batch_tile", "compute_dtype", "out_dtype"))
def net_1d_forward(x, w1, b1, w2, b2, *, batch_tile=16384,
                   compute_dtype=jnp.bfloat16, out_dtype=None):
    B, num_mtdt = x.shape
    out_channel = w2.shape[1]
    out_dtype = x.dtype if out_dtype is None else out_dtype
    cd = jnp.dtype(compute_dtype)

    # Lane-packing factor: pack rows so the packed output width is a multiple
    # of 128 lanes (unmasked stores).  Capped at 8 so the block-diagonal
    # weights stay tiny / fully VMEM-resident and the extra MXU work from the
    # block-diagonal expansion (pack x useful flops) stays well inside the
    # memory-bound regime even on v5e.
    pack = max(1, min(128 // math.gcd(out_channel, 128), 8))

    # Batch-tile alignment: tb/pack must be a multiple of 16 (covers bf16
    # sublane packing of the x block; f32 only needs 8).
    align = 16 * pack
    tb = min(_round_up(batch_tile, align), _round_up(B, align))
    B_pad = _round_up(B, tb)
    grid = (B_pad // tb,)

    # --- build packed operands (tiny; fused by XLA with the bf16 cast) -----
    x_p = jnp.pad(x, ((0, B_pad - B), (0, 0))).astype(cd)
    x_packed = x_p.reshape(B_pad // pack, pack * num_mtdt)   # free reshape

    eye = jnp.eye(pack, dtype=w1.dtype)
    w1_big = jnp.kron(eye, w1).astype(cd)                 # (pack*K, pack*64)
    w2_big = jnp.kron(eye, w2).astype(cd)                 # (pack*64, pack*out)
    b1_big = jnp.tile(b1.reshape(1, HIDDEN), (1, pack)).astype(jnp.float32)
    b2_big = jnp.tile(b2.reshape(1, out_channel), (1, pack)).astype(jnp.float32)

    out_w = pack * out_channel
    out_rows = B_pad // pack
    tb_rows = tb // pack

    # Cost of what the kernel actually executes (block-diagonal matmuls do
    # pack x the useful flops).
    cost = pl.CostEstimate(
        flops=2 * B_pad * pack * (num_mtdt * HIDDEN + HIDDEN * out_channel),
        transcendentals=0,
        bytes_accessed=(x_packed.size * x_packed.dtype.itemsize
                        + w1_big.size * w1_big.dtype.itemsize
                        + w2_big.size * w2_big.dtype.itemsize
                        + b1_big.size * b1_big.dtype.itemsize
                        + b2_big.size * b2_big.dtype.itemsize
                        + out_rows * out_w * jnp.dtype(out_dtype).itemsize),
    )

    out_packed = pl.pallas_call(
        _mlp_kernel,
        out_shape=jax.ShapeDtypeStruct((out_rows, out_w), out_dtype),
        grid_spec=pltpu.PrefetchScalarGridSpec(
            num_scalar_prefetch=0,
            grid=grid,
            in_specs=[
                # x tile: marches along the batch axis.
                pl.BlockSpec((tb_rows, pack * num_mtdt), lambda i: (i, 0)),
                # Weights / biases: constant index_map -> DMA'd once, resident.
                pl.BlockSpec((pack * num_mtdt, pack * HIDDEN), lambda i: (0, 0)),
                pl.BlockSpec((1, pack * HIDDEN), lambda i: (0, 0)),
                pl.BlockSpec((pack * HIDDEN, out_w), lambda i: (0, 0)),
                pl.BlockSpec((1, out_w), lambda i: (0, 0)),
            ],
            out_specs=pl.BlockSpec((tb_rows, out_w), lambda i: (i, 0)),
        ),
        compiler_params=pltpu.CompilerParams(
            dimension_semantics=("parallel",),      # megacore-shardable on v7x
            vmem_limit_bytes=32 * 1024 * 1024,      # footprint ~12 MiB; explicit
        ),
        cost_estimate=cost,
    )(x_packed, w1_big, b1_big, w2_big, b2_big)

    # Row-major unpack is free; slice drops the batch padding (no-op when
    # B is already a multiple of the tile).
    return out_packed.reshape(B_pad, out_channel)[:B]


def init_params(key, num_mtdt, out_channel, dtype=jnp.float32):
    """Deterministic init mirroring torch.nn.Linear defaults
    (uniform(-1/sqrt(fan_in), 1/sqrt(fan_in)))."""
    k1, k2, k3, k4 = jax.random.split(key, 4)
    lim1 = 1.0 / (num_mtdt ** 0.5)
    lim2 = 1.0 / (HIDDEN ** 0.5)
    w1 = jax.random.uniform(k1, (num_mtdt, HIDDEN), dtype, -lim1, lim1)
    b1 = jax.random.uniform(k2, (1, HIDDEN), dtype, -lim1, lim1)
    w2 = jax.random.uniform(k3, (HIDDEN, out_channel), dtype, -lim2, lim2)
    b2 = jax.random.uniform(k4, (1, out_channel), dtype, -lim2, lim2)
    return w1, b1, w2, b2


def net_1d_reference(x, w1, b1, w2, b2, compute_dtype=jnp.bfloat16):
    """Pure-JAX reference matching the kernel's precision choices
    (bf16 operands, f32 accumulation, f32 bias/ReLU)."""
    cd = compute_dtype
    h = jnp.dot(x.astype(cd), w1.astype(cd), preferred_element_type=jnp.float32)
    h = jnp.maximum(h + b1, 0.0)
    y = jnp.dot(h.astype(cd), w2.astype(cd), preferred_element_type=jnp.float32)
    return jnp.maximum(y + b2, 0.0)


if __name__ == "__main__":
    key = jax.random.PRNGKey(0)
    k_x, k_p = jax.random.split(key)

    batch, num_mtdt, out_channel = 8, 16, 32
    x = jax.random.normal(k_x, (batch, num_mtdt), jnp.float32)
    w1, b1, w2, b2 = init_params(k_p, num_mtdt, out_channel)

    out = jax.block_until_ready(net_1d_forward(x, w1, b1, w2, b2))
    assert out.shape == (batch, out_channel)

    # Strict check vs precision-matched reference (bf16 operands, f32 accum).
    ref = net_1d_reference(x, w1, b1, w2, b2)
    assert jnp.allclose(out.astype(jnp.float32), ref, atol=1e-4, rtol=1e-4), \
        "mismatch vs precision-matched reference"

    # Loose sanity check vs the full-f32 module semantics.
    ref_f32 = net_1d_reference(x, w1, b1, w2, b2, compute_dtype=jnp.float32)
    assert jnp.allclose(out.astype(jnp.float32), ref_f32, atol=5e-2, rtol=5e-2), \
        "mismatch vs f32 reference beyond bf16 tolerance"

    print("KERNEL_OK")
</pallas_src>

<mosaic_0001>
module attributes {stable_mosaic.version = 11 : i64} {
  func.func @_mlp_kernel(%arg0: i32, %arg1: memref<16x64xbf16, #tpu.memory_space<vmem>>, %arg2: memref<64x256xbf16, #tpu.memory_space<vmem>>, %arg3: memref<1x256xf32, #tpu.memory_space<vmem>>, %arg4: memref<256x128xbf16, #tpu.memory_space<vmem>>, %arg5: memref<1x128xf32, #tpu.memory_space<vmem>>, %arg6: memref<16x128xf32, #tpu.memory_space<vmem>>) attributes {dimension_semantics = [#tpu.dimension_semantics<parallel>], iteration_bounds = array<i64: 1>, scalar_prefetch = 0 : i64, scratch_operands = 0 : i64, tpu.core_type = #tpu.core_type<tc>, window_params = [{transform_indices = @transform_0, window_bounds = array<i64: 16, 64>}, {pipeline_mode = #tpu.pipeline_mode<synchronous>, transform_indices = @transform_1, window_bounds = array<i64: 64, 256>}, {pipeline_mode = #tpu.pipeline_mode<synchronous>, transform_indices = @transform_2, window_bounds = array<i64: 1, 256>}, {pipeline_mode = #tpu.pipeline_mode<synchronous>, transform_indices = @transform_3, window_bounds = array<i64: 256, 128>}, {pipeline_mode = #tpu.pipeline_mode<synchronous>, transform_indices = @transform_4, window_bounds = array<i64: 1, 128>}, {transform_indices = @transform_5, window_bounds = array<i64: 16, 128>}]} {
    %c0 = arith.constant 0 : index
    %c0_0 = arith.constant 0 : index
    %0 = vector.load %arg1[%c0, %c0_0] : memref<16x64xbf16, #tpu.memory_space<vmem>>, vector<16x64xbf16>
    %c0_1 = arith.constant 0 : index
    %c0_2 = arith.constant 0 : index
    %1 = vector.load %arg2[%c0_1, %c0_2] : memref<64x256xbf16, #tpu.memory_space<vmem>>, vector<64x256xbf16>
    %cst = arith.constant dense<0.000000e+00> : vector<16x256xf32>
    %2 = tpu.matmul %0, %1, %cst {dimension_numbers = #tpu.dot_dimension_numbers<[1], [0], [0], [1], [0, 0, 1, 1], [], []>} : vector<16x64xbf16>, vector<64x256xbf16>, vector<16x256xf32> -> vector<16x256xf32>
    %c0_3 = arith.constant 0 : index
    %c0_4 = arith.constant 0 : index
    %3 = vector.load %arg3[%c0_3, %c0_4] : memref<1x256xf32, #tpu.memory_space<vmem>>, vector<1x256xf32>
    %4 = vector.broadcast %3 : vector<1x256xf32> to vector<16x256xf32>
    %5 = arith.addf %2, %4 : vector<16x256xf32>
    %cst_5 = arith.constant 0.000000e+00 : f32
    %6 = vector.broadcast %cst_5 : f32 to vector<16x256xf32>
    %7 = arith.maximumf %5, %6 : vector<16x256xf32>
    %8 = arith.truncf %7 : vector<16x256xf32> to vector<16x256xbf16>
    %c0_6 = arith.constant 0 : index
    %c0_7 = arith.constant 0 : index
    %9 = vector.load %arg4[%c0_6, %c0_7] : memref<256x128xbf16, #tpu.memory_space<vmem>>, vector<256x128xbf16>
    %cst_8 = arith.constant dense<0.000000e+00> : vector<16x128xf32>
    %10 = tpu.matmul %8, %9, %cst_8 {dimension_numbers = #tpu.dot_dimension_numbers<[1], [0], [0], [1], [0, 0, 1, 1], [], []>} : vector<16x256xbf16>, vector<256x128xbf16>, vector<16x128xf32> -> vector<16x128xf32>
    %c0_9 = arith.constant 0 : index
    %c0_10 = arith.constant 0 : index
    %11 = vector.load %arg5[%c0_9, %c0_10] : memref<1x128xf32, #tpu.memory_space<vmem>>, vector<1x128xf32>
    %12 = vector.broadcast %11 : vector<1x128xf32> to vector<16x128xf32>
    %13 = arith.addf %10, %12 : vector<16x128xf32>
    %cst_11 = arith.constant 0.000000e+00 : f32
    %14 = vector.broadcast %cst_11 : f32 to vector<16x128xf32>
    %15 = arith.maximumf %13, %14 : vector<16x128xf32>
    %c0_12 = arith.constant 0 : index
    %c0_13 = arith.constant 0 : index
    %16 = vector.load %arg6[%c0_12, %c0_13] : memref<16x128xf32, #tpu.memory_space<vmem>>, vector<16x128xf32>
    tpu.vector_store %arg6[%c0_12, %c0_13], %15 {strides = array<i32>} : memref<16x128xf32, #tpu.memory_space<vmem>>, vector<16x128xf32>,
    return
  }
  func.func @transform_0(%arg0: i32) -> (i32, i32) {
    %c0_i32 = arith.constant 0 : i32
    %c0_i32_0 = arith.constant 0 : i32
    return %arg0, %c0_i32 : i32, i32
  }
  func.func @transform_1(%arg0: i32) -> (i32, i32) {
    %c0_i32 = arith.constant 0 : i32
    %c0_i32_0 = arith.constant 0 : i32
    %c0_i32_1 = arith.constant 0 : i32
    return %c0_i32, %c0_i32_0 : i32, i32
  }
  func.func @transform_2(%arg0: i32) -> (i32, i32) {
    %c0_i32 = arith.constant 0 : i32
    %c0_i32_0 = arith.constant 0 : i32
    %c0_i32_1 = arith.constant 0 : i32
    return %c0_i32, %c0_i32_0 : i32, i32
  }
  func.func @transform_3(%arg0: i32) -> (i32, i32) {
    %c0_i32 = arith.constant 0 : i32
    %c0_i32_0 = arith.constant 0 : i32
    %c0_i32_1 = arith.constant 0 : i32
    return %c0_i32, %c0_i32_0 : i32, i32
  }
  func.func @transform_4(%arg0: i32) -> (i32, i32) {
    %c0_i32 = arith.constant 0 : i32
    %c0_i32_0 = arith.constant 0 : i32
    %c0_i32_1 = arith.constant 0 : i32
    return %c0_i32, %c0_i32_0 : i32, i32
  }
  func.func @transform_5(%arg0: i32) -> (i32, i32) {
    %c0_i32 = arith.constant 0 : i32
    %c0_i32_0 = arith.constant 0 : i32
    return %arg0, %c0_i32 : i32, i32
  }
}

</mosaic_0001>

<bundles_post_ra>
// kernel: net_1d_forward.1
= control target key start
LH: loop header
LB: loop body
LE: loop exit
PB: predicated region body
PF: predicated region fallthrough
CT: control target
= control target key end

     0   :  { %vm82_vm0 = vcmask 523264   ;;  %s557_s1 = inlined_call_operand.vmem [shape: bf16[64,256], index: 1, kind: input, shape index: {}]   ;;  %s558_s3 = inlined_call_operand.vmem [shape: bf16[256,128], index: 3, kind: input, shape index: {}]   ;;  %s559_s0 = inlined_call_operand.vmem [shape: bf16[16,64], index: 0, kind: input, shape index: {}]   ;;  %s560_s4 = inlined_call_operand.vmem [shape: f32[1,128], index: 4, kind: input, shape index: {}]   ;;  %s561_s2 = inlined_call_operand.vmem [shape: f32[1,256], index: 2, kind: input, shape index: {}]   ;;  %s562_s5 = inlined_call_operand.vmem [shape: f32[16,128], index: 5, kind: output, shape index: {}]  }
   0x1   :  { %v318_v0 = vld [vmem:[%s557_s1 + $0x30] sm:$0xf]  ;;  %v398_v1 = vld [vmem:[%s557_s1 + $0x34] sm:$0xf0]  ;;  %v397_v2 = vld [vmem:[%s557_s1 + $0x34] sm:$0xf] }
   0x2   :  { %v319_v3 = vor.u32 %v398_v1, %v318_v0  ;;  %v320_v4 = vld [vmem:[%s557_s1 + $0x38] sm:$0xf0]  ;;  %v310_v5 = vld [vmem:[%s557_s1 + $0x20] sm:$0xf]  ;;  %v396_v6 = vld [vmem:[%s557_s1 + $0x24] sm:$0xf0] }
   0x3   :  { %v323_v7 = vor.u32 %v397_v2, %v320_v4  ;;  %v395_v8 = vld [vmem:[%s557_s1 + $0x24] sm:$0xf]  ;;  %v312_v9 = vld [vmem:[%s557_s1 + $0x28] sm:$0xf0]  ;;  %v311_v10 = vor.u32 %v396_v6, %v310_v5  ;;  %v302_v12 = vld [vmem:[%s557_s1 + $0x10] sm:$0xf] }
   0x4   :  { %90 = vmatpush.bf16.msra.mxu0 %v319_v3  ;;  %v315_v11 = vor.u32 %v395_v8, %v312_v9  ;;  %v394_v13 = vld [vmem:[%s557_s1 + $0x14] sm:$0xf0]  ;;  %v393_v14 = vld [vmem:[%s557_s1 + $0x14] sm:$0xf]  ;;  %v304_v15 = vld [vmem:[%s557_s1 + $0x18] sm:$0xf0] }
   0x5   :  { %104 = vmatpush.bf16.msra.mxu1 %v323_v7  ;;  %v406_v16 = vld [vmem:[%s558_s3 + $0x38] sm:$0xff]  ;;  %v303_v18 = vor.u32 %v394_v13, %v302_v12  ;;  %v405_v19 = vld [vmem:[%s558_s3 + $0x30] sm:$0xff]  ;;  %v307_v20 = vor.u32 %v393_v14, %v304_v15  ;;  %v294_v21 = vld [vmem:[%s557_s1] sm:$0xf] }
   0x6   :  { %v414_v17 = vld [vmem:[%s558_s3 + $0x78] sm:$0xff]  ;;  %252 = vmatpush.bf16.msra.mxu2 %v406_v16  ;;  %v392_v22 = vld [vmem:[%s557_s1 + $0x4] sm:$0xf0]  ;;  %v413_v23 = vld [vmem:[%s558_s3 + $0x70] sm:$0xff] }
   0x7   :  { %266 = vmatpush.bf16.msra.mxu3 %v414_v17  ;;  %v391_v24 = vld [vmem:[%s557_s1 + $0x4] sm:$0xf]  ;;  %v296_v25 = vld [vmem:[%s557_s1 + $0x8] sm:$0xf0]  ;;  %v295_v26 = vor.u32 %v392_v22, %v294_v21  ;;  %v402_v33 = vld [vmem:[%s558_s3 + $0x18] sm:$0xff] }
   0x8   :  { %91 = vmatpush.bf16.msra.mxu0 %v311_v10  ;;  %v404_v27 = vld [vmem:[%s558_s3 + $0x28] sm:$0xff]  ;;  %v299_v28 = vor.u32 %v391_v24, %v296_v25  ;;  %v390_v30 = vld [vmem:[%s559_s0] sm:$0xff]  ;;  %v410_v34 = vld [vmem:[%s558_s3 + $0x58] sm:$0xff] }
   0x9   :  { %105 = vmatpush.bf16.msra.mxu1 %v315_v11  ;;  %v412_v29 = vld [vmem:[%s558_s3 + $0x68] sm:$0xff]  ;;  %v403_v31 = vld [vmem:[%s558_s3 + $0x20] sm:$0xff]  ;;  %v401_v35 = vld [vmem:[%s558_s3 + $0x10] sm:$0xff] }
   0xa   :  { %253 = vmatpush.bf16.msra.mxu2 %v405_v19  ;;  %v411_v32 = vld [vmem:[%s558_s3 + $0x60] sm:$0xff]  ;;  %v409_v36 = vld [vmem:[%s558_s3 + $0x50] sm:$0xff]  ;;  %v400_v37 = vld [vmem:[%s558_s3 + $0x8] sm:$0xff] }
   0xb   :  { %267 = vmatpush.bf16.msra.mxu3 %v413_v23  ;;  %v408_v38 = vld [vmem:[%s558_s3 + $0x48] sm:$0xff]  ;;  %v399_v39 = vld [vmem:[%s558_s3] sm:$0xff] }
   0xc   :  { %92 = vmatpush.bf16.msra.mxu0 %v303_v18  ;;  %v407_v40 = vld [vmem:[%s558_s3 + $0x40] sm:$0xff] }
   0xd   :  { %106 = vmatpush.bf16.msra.mxu1 %v307_v20  ;;  %v31_v41 = vld [vmem:[%s561_s2] sm:$0x3] }
   0xe   :  { %254 = vmatpush.bf16.msra.mxu2 %v404_v27  ;;  %v33_v44 = vperm.slane %v31_v41, 0  ;;  %v34_v45 = vperm.slane %v31_v41, 1  ;;  %v415_v58 = vld [vmem:[%s560_s4] ss:$0 sm:$0xff] }
   0xf   :  { %268 = vmatpush.bf16.msra.mxu3 %v412_v29 }
  0x10   :  { %93 = vmatpush.bf16.msra.mxu0 %v295_v26 }
  0x11   :  { %107 = vmatpush.bf16.msra.mxu1 %v299_v28 }
  0x12   :  { %255 = vmatpush.bf16.msra.mxu2 %v403_v31 }
  0x13   :  { %324 = vmatmul.msk.bf16.vlgmr.msra.gmra.mxu0 %vm82_vm0, %v390_v30  ;;  %269 = vmatpush.bf16.msra.mxu3 %v411_v32 }
  0x14   :  { %325 = vmatmul.msk.bf16.vlgmr.msra.gmra.mxu1 %vm82_vm0, %v390_v30 }
  0x16   :  { %256 = vmatpush.bf16.msra.mxu2 %v402_v33 }
  0x17   :  { %270 = vmatpush.bf16.msra.mxu3 %v410_v34 }
  0x1a   :  { %257 = vmatpush.bf16.msra.mxu2 %v401_v35 }
  0x1b   :  { %271 = vmatpush.bf16.msra.mxu3 %v409_v36 }
  0x1e   :  { %258 = vmatpush.bf16.msra.mxu2 %v400_v37 }
  0x1f   :  { %272 = vmatpush.bf16.msra.mxu3 %v408_v38 }
  0x22   :  { %259 = vmatpush.bf16.msra.mxu2 %v399_v39 }
  0x23   :  { %273 = vmatpush.bf16.msra.mxu3 %v407_v40 }
  0x90   :  { %v95_v42 = vpop.f32.mrf.mxu0 }
  0x91   :  { %v109_v43 = vpop.f32.mrf.mxu1  ;;  %v96_v46 = vadd.f32 %v95_v42, %v33_v44 }
  0x92   :  { %v110_v47 = vadd.f32 %v109_v43, %v34_v45 }
  0x93   :  { %v114_v52 = vmax.f32 %v96_v46, 0.0 }
  0x94   :  { %v115_v54 = vmax.f32 %v110_v47, 0.0 }
  0x98   :  { %v97_v48 = vpop.f32.mrf.mxu0 }
  0x99   :  { %v98_v49 = vadd.f32 %v97_v48, %v33_v44  ;;  %v111_v50 = vpop.f32.mrf.mxu1 }
  0x9a   :  { %v112_v51 = vadd.f32 %v111_v50, %v34_v45 }
  0x9b   :  { %v116_v53 = vmax.f32 %v98_v49, 0.0 }
  0x9c   :  { %v117_v55 = vmax.f32 %v112_v51, 0.0 }
  0x9d   :  { %v118_v56 = vpack.c.bf16 %v116_v53, %v114_v52 }
  0x9e   :  { %v119_v57 = vpack.c.bf16 %v117_v55, %v115_v54 }
  0x9f   :  { %260 = vmatmul.bf16.vlgmr.msra.gmra.mxu2 %v118_v56 }
  0xa0   :  { %274 = vmatmul.bf16.vlgmr.msra.gmra.mxu3 %v119_v57 }
 0x122   :  { %v261_v59 = vpop.f32.mrf.mxu2 }
 0x123   :  { %v262_v60 = vadd.f32 %v415_v58, %v261_v59  ;;  %v275_v61 = vpop.f32.mrf.mxu3 }
 0x125   :  { %v276_v62 = vadd.f32 %v275_v61, %v262_v60 }
 0x127   :  { %v280_v63 = vmax.f32 %v276_v62, 0.0 }
 0x129   :  { %282 = vst [vmem:[%s562_s5] sm:$0xff] %v280_v63 }
 0x12a   :  { %v263_v0 = vpop.f32.mrf.mxu2 }
 0x12b   :  { %v264_v1 = vadd.f32 %v415_v58, %v263_v0  ;;  %v277_v2 = vpop.f32.mrf.mxu3 }
 0x12d   :  { %v278_v3 = vadd.f32 %v277_v2, %v264_v1 }
 0x12f   :  { %v281_v4 = vmax.f32 %v278_v3, 0.0 }
 0x131   :  { %283 = vst [vmem:[%s562_s5 + $0x8] sm:$0xff] %v281_v4 }

</bundles_post_ra>
